<compile_context>
chip_gen: v7x
topology: tpu7x:2x2x1
jax: 0.10.0
libtpu: 0.0.40
codegen_flags: <defaults>
</compile_context>

<pallas_src>
import jax
import jax.numpy as jnp
from jax.experimental import pallas as pl
from jax.experimental.pallas import tpu as pltpu


# --------------------------------------------------------------------------
# helpers
# --------------------------------------------------------------------------
def _round_up(x, m):
    return ((x + m - 1) // m) * m


def _cdiv(a, b):
    return -(-a // b)


def _moving_avg_matrix(seq_len, kernel_size, dtype=jnp.float32):
    """A[i, j] s.t. trend[i] = sum_j A[i, j] * x[j] (edge-replicated AvgPool1d)."""
    pad = (kernel_size - 1) // 2
    idx = jnp.clip(
        jnp.arange(seq_len)[:, None] + jnp.arange(kernel_size)[None, :] - pad,
        0, seq_len - 1)                                            # (S, k)
    A = jnp.zeros((seq_len, seq_len), dtype).at[
        jnp.arange(seq_len)[:, None], idx].add(1.0 / kernel_size)
    return A


# --------------------------------------------------------------------------
# kernels: one dense matmul + bias per tile (weight/bias stay VMEM-resident)
# --------------------------------------------------------------------------
def _dlinear_lanes_kernel(w_ref, b_ref, x_ref, o_ref):
    # w: (P, S), b: (P, 1), x: (S, bn), o: (P, bn)
    acc = jnp.dot(w_ref[...], x_ref[...], preferred_element_type=jnp.float32)
    o_ref[...] = (acc + b_ref[...]).astype(o_ref.dtype)


def _dlinear_native_kernel(w_ref, b_ref, x_ref, o_ref):
    # w: (P, S), b: (P, 1), x: (1, S, Cb), o: (1, P, Cb)
    acc = jnp.dot(w_ref[...], x_ref[0], preferred_element_type=jnp.float32)
    o_ref[0] = (acc + b_ref[...]).astype(o_ref.dtype)


# --------------------------------------------------------------------------
# block / VMEM sizing
# --------------------------------------------------------------------------
_VMEM_TILE_BUDGET = 40 << 20      # bytes for double-buffered tiles + weight
_VMEM_LIMIT_CAP = 56 << 20        # stay under v7x's 64 MiB physical VMEM


def _pick_lane_block(n_lanes, target, per_lane_bytes, weight_bytes):
    """Largest lane block (multiple of 128) fitting the VMEM tile budget."""
    avail = max(_VMEM_TILE_BUDGET - 2 * weight_bytes, 1 << 20)
    max_b = max(128, (avail // per_lane_bytes) // 128 * 128)
    b = min(target, max_b, _round_up(n_lanes, 128))
    return max(128, (b // 128) * 128)


def _vmem_limit_bytes(weight_bytes, tile_bytes):
    need = 2 * (weight_bytes + tile_bytes) + (4 << 20)
    return int(min(max(need, 32 << 20), _VMEM_LIMIT_CAP))


# --------------------------------------------------------------------------
# forward
# --------------------------------------------------------------------------
def make_dlinear_forward(w_seasonal, b_seasonal, w_trend, b_trend, kernel_size,
                         *, lane_block=512):
    """Fold the decomposition + both Linear layers ONCE and return a jitted
    forward(x: (B, seq_len, C)) -> (B, pred_len, C)."""
    # The PyTorch module only produces consistent shapes for odd kernel sizes
    # (pad = (k-1)//2 on both sides).
    assert kernel_size % 2 == 1, "DLinear moving average requires odd kernel_size"
    P, S = w_seasonal.shape

    # ---- one-time fold (hoisted out of the per-call hot path) ----
    A = _moving_avg_matrix(S, kernel_size, jnp.float32)
    ws = w_seasonal.astype(jnp.float32)
    wt = w_trend.astype(jnp.float32)
    w_comb = ws + jnp.dot(wt - ws, A)                              # (P, S)
    b_comb = (b_seasonal + b_trend).astype(jnp.float32).reshape(P, 1)

    @jax.jit
    def forward(x):
        B, S_in, C = x.shape
        assert S_in == S, f"expected seq_len={S}, got {S_in}"
        itemsize = jnp.dtype(x.dtype).itemsize
        w_k = w_comb.astype(x.dtype)              # bf16-friendly MXU path
        weight_bytes = P * S * itemsize + P * 4
        per_lane_bytes = 2 * (S + P) * itemsize   # double-buffered in+out tiles

        if C % 128 == 0:
            # ---- channels-dense path: native layout, zero wrapper transposes --
            cb = _pick_lane_block(C, lane_block, per_lane_bytes, weight_bytes)
            while C % cb:
                cb -= 128
            grid = (B, C // cb)
            return pl.pallas_call(
                _dlinear_native_kernel,
                out_shape=jax.ShapeDtypeStruct((B, P, C), x.dtype),
                grid=grid,
                in_specs=[
                    pl.BlockSpec((P, S), lambda b, c: (0, 0)),   # VMEM-resident
                    pl.BlockSpec((P, 1), lambda b, c: (0, 0)),
                    pl.BlockSpec((1, S, cb), lambda b, c: (b, 0, c)),
                ],
                out_specs=pl.BlockSpec((1, P, cb), lambda b, c: (b, 0, c)),
                compiler_params=pltpu.CompilerParams(
                    dimension_semantics=("parallel", "parallel"),
                    vmem_limit_bytes=_vmem_limit_bytes(
                        weight_bytes, (S + P) * cb * itemsize)),
                cost_estimate=pl.CostEstimate(
                    flops=2 * P * S * B * C,
                    transcendentals=0,
                    bytes_accessed=itemsize * (S + P) * B * C + weight_bytes),
            )(w_k, b_comb, x)

        # ---- fallback path: relayout so B*C is the lane-dense matmul N ----
        N = B * C
        bn = _pick_lane_block(N, lane_block, per_lane_bytes, weight_bytes)
        n_tiles = _cdiv(N, bn)
        if n_tiles == 1 and N > 128:
            # keep >= 2 tiles so both v7x TensorCores get work
            bn = _round_up(_cdiv(N, 2), 128)
            n_tiles = _cdiv(N, bn)
        Npad = n_tiles * bn

        x2 = jnp.transpose(x, (1, 0, 2)).reshape(S, N)
        if Npad != N:
            x2 = jnp.pad(x2, ((0, 0), (0, Npad - N)))

        out = pl.pallas_call(
            _dlinear_lanes_kernel,
            out_shape=jax.ShapeDtypeStruct((P, Npad), x.dtype),
            grid=(n_tiles,),
            in_specs=[
                pl.BlockSpec((P, S), lambda n: (0, 0)),          # VMEM-resident
                pl.BlockSpec((P, 1), lambda n: (0, 0)),
                pl.BlockSpec((S, bn), lambda n: (0, n)),
            ],
            out_specs=pl.BlockSpec((P, bn), lambda n: (0, n)),
            compiler_params=pltpu.CompilerParams(
                dimension_semantics=("parallel",),
                vmem_limit_bytes=_vmem_limit_bytes(
                    weight_bytes, (S + P) * bn * itemsize)),
            cost_estimate=pl.CostEstimate(
                flops=2 * P * S * Npad,
                transcendentals=0,
                bytes_accessed=itemsize * (S + P) * Npad + weight_bytes),
        )(w_k, b_comb, x2)

        out = out[:, :N].reshape(P, B, C)
        return jnp.transpose(out, (1, 0, 2))

    return forward


def dlinear_forward(x, w_seasonal, b_seasonal, w_trend, b_trend, kernel_size):
    """One-shot convenience wrapper (fold is cached inside make_dlinear_forward
    for repeated use; this rebuilds it each call)."""
    return make_dlinear_forward(
        w_seasonal, b_seasonal, w_trend, b_trend, kernel_size)(x)


# --------------------------------------------------------------------------
# pure-JAX reference mirroring the PyTorch forward
# --------------------------------------------------------------------------
def dlinear_reference(x, w_seasonal, b_seasonal, w_trend, b_trend, kernel_size):
    pad = (kernel_size - 1) // 2
    front = jnp.repeat(x[:, 0:1, :], pad, axis=1)
    end = jnp.repeat(x[:, -1:, :], pad, axis=1)
    xpad = jnp.concatenate([front, x, end], axis=1)           # (B, Lpad, C)
    seq_len = x.shape[1]
    windows = jnp.stack(
        [xpad[:, j:j + seq_len, :] for j in range(kernel_size)], axis=0)
    trend = jnp.mean(windows, axis=0)                         # (B, S, C)
    seasonal = x - trend
    s_out = jnp.einsum('bsc,ps->bpc', seasonal, w_seasonal) + b_seasonal[None, :, None]
    t_out = jnp.einsum('bsc,ps->bpc', trend, w_trend) + b_trend[None, :, None]
    return s_out + t_out                                      # (B, pred_len, C)


if __name__ == "__main__":
    B, seq_len, pred_len, decomp_kernal = 2, 16, 8, 5

    key = jax.random.PRNGKey(0)
    kx1, kx2, kws, kbs, kwt, kbt = jax.random.split(key, 6)

    # nn.Linear(seq_len, pred_len) default init: U(-1/sqrt(seq_len), 1/sqrt(seq_len))
    bound = 1.0 / (seq_len ** 0.5)
    w_seasonal = jax.random.uniform(kws, (pred_len, seq_len), jnp.float32, -bound, bound)
    b_seasonal = jax.random.uniform(kbs, (pred_len,), jnp.float32, -bound, bound)
    w_trend = jax.random.uniform(kwt, (pred_len, seq_len), jnp.float32, -bound, bound)
    b_trend = jax.random.uniform(kbt, (pred_len,), jnp.float32, -bound, bound)

    forward = make_dlinear_forward(w_seasonal, b_seasonal, w_trend, b_trend,
                                   decomp_kernal)

    # Path 1: small channel count -> lane-relayout fallback path.
    C1 = 4
    x1 = jax.random.normal(kx1, (B, seq_len, C1), dtype=jnp.float32)
    out1 = jax.block_until_ready(forward(x1))
    ref1 = dlinear_reference(x1, w_seasonal, b_seasonal, w_trend, b_trend,
                             decomp_kernal)
    assert out1.shape == (B, pred_len, C1)
    assert jnp.allclose(out1, ref1, atol=1e-5, rtol=1e-5), \
        float(jnp.max(jnp.abs(out1 - ref1)))

    # Path 2: lane-dense channel count -> native-layout path (no HBM relayout).
    C2 = 128
    x2 = jax.random.normal(kx2, (B, seq_len, C2), dtype=jnp.float32)
    out2 = jax.block_until_ready(forward(x2))
    ref2 = dlinear_reference(x2, w_seasonal, b_seasonal, w_trend, b_trend,
                             decomp_kernal)
    assert out2.shape == (B, pred_len, C2)
    assert jnp.allclose(out2, ref2, atol=1e-5, rtol=1e-5), \
        float(jnp.max(jnp.abs(out2 - ref2)))

    print("KERNEL_OK")
</pallas_src>

<mosaic_0001>
module attributes {stable_mosaic.version = 11 : i64} {
  func.func @_dlinear_lanes_kernel(%arg0: i32, %arg1: memref<8x16xf32, #tpu.memory_space<vmem>>, %arg2: memref<8x1xf32, #tpu.memory_space<vmem>>, %arg3: memref<16x128xf32, #tpu.memory_space<vmem>>, %arg4: memref<8x128xf32, #tpu.memory_space<vmem>>) attributes {dimension_semantics = [#tpu.dimension_semantics<parallel>], iteration_bounds = array<i64: 1>, scalar_prefetch = 0 : i64, scratch_operands = 0 : i64, tpu.core_type = #tpu.core_type<tc>, window_params = [{pipeline_mode = #tpu.pipeline_mode<synchronous>, transform_indices = @transform_0, window_bounds = array<i64: 8, 16>}, {pipeline_mode = #tpu.pipeline_mode<synchronous>, transform_indices = @transform_1, window_bounds = array<i64: 8, 1>}, {transform_indices = @transform_2, window_bounds = array<i64: 16, 128>}, {transform_indices = @transform_3, window_bounds = array<i64: 8, 128>}]} {
    %c0 = arith.constant 0 : index
    %c0_0 = arith.constant 0 : index
    %0 = vector.load %arg1[%c0, %c0_0] : memref<8x16xf32, #tpu.memory_space<vmem>>, vector<8x16xf32>
    %c0_1 = arith.constant 0 : index
    %c0_2 = arith.constant 0 : index
    %1 = vector.load %arg3[%c0_1, %c0_2] : memref<16x128xf32, #tpu.memory_space<vmem>>, vector<16x128xf32>
    %cst = arith.constant dense<0.000000e+00> : vector<8x128xf32>
    %2 = tpu.matmul %0, %1, %cst {dimension_numbers = #tpu.dot_dimension_numbers<[1], [0], [0], [1], [0, 0, 1, 1], [], []>} : vector<8x16xf32>, vector<16x128xf32>, vector<8x128xf32> -> vector<8x128xf32>
    %c0_3 = arith.constant 0 : index
    %c0_4 = arith.constant 0 : index
    %3 = vector.load %arg2[%c0_3, %c0_4] : memref<8x1xf32, #tpu.memory_space<vmem>>, vector<8x1xf32>
    %4 = vector.broadcast %3 : vector<8x1xf32> to vector<8x128xf32>
    %5 = arith.addf %2, %4 : vector<8x128xf32>
    %c0_5 = arith.constant 0 : index
    %c0_6 = arith.constant 0 : index
    %6 = vector.load %arg4[%c0_5, %c0_6] : memref<8x128xf32, #tpu.memory_space<vmem>>, vector<8x128xf32>
    tpu.vector_store %arg4[%c0_5, %c0_6], %5 {strides = array<i32>} : memref<8x128xf32, #tpu.memory_space<vmem>>, vector<8x128xf32>,
    return
  }
  func.func @transform_0(%arg0: i32) -> (i32, i32) {
    %c0_i32 = arith.constant 0 : i32
    %c0_i32_0 = arith.constant 0 : i32
    %c0_i32_1 = arith.constant 0 : i32
    return %c0_i32, %c0_i32_0 : i32, i32
  }
  func.func @transform_1(%arg0: i32) -> (i32, i32) {
    %c0_i32 = arith.constant 0 : i32
    %c0_i32_0 = arith.constant 0 : i32
    %c0_i32_1 = arith.constant 0 : i32
    return %c0_i32, %c0_i32_0 : i32, i32
  }
  func.func @transform_2(%arg0: i32) -> (i32, i32) {
    %c0_i32 = arith.constant 0 : i32
    %c0_i32_0 = arith.constant 0 : i32
    return %c0_i32, %arg0 : i32, i32
  }
  func.func @transform_3(%arg0: i32) -> (i32, i32) {
    %c0_i32 = arith.constant 0 : i32
    %c0_i32_0 = arith.constant 0 : i32
    return %c0_i32, %arg0 : i32, i32
  }
}

</mosaic_0001>

<bundles_post_ra>
// kernel: forward.1
= control target key start
LH: loop header
LB: loop body
LE: loop exit
PB: predicated region body
PF: predicated region fallthrough
CT: control target
= control target key end

     0   :  { %v121_v0 = vmov 0.0|0.0   ;;  %vm122_vm0 = vmmov 0   ;;  %v123_v3 = vmov 0.0   ;;  %v124_v5 = vmov 0   ;;  %s160_s2 = inlined_call_operand.vmem [shape: f32[16,128], index: 2, kind: input, shape index: {}]   ;;  %s161_s1 = inlined_call_operand.vmem [shape: f32[8,1], index: 1, kind: input, shape index: {}]   ;;  %s162_s0 = inlined_call_operand.vmem [shape: f32[8,16], index: 0, kind: input, shape index: {}]   ;;  %s163_s3 = inlined_call_operand.vmem [shape: f32[8,128], index: 3, kind: output, shape index: {}]  }
   0x1   :  { %113 = vmatprep.subr.bf16.mxu0 %v121_v0  ;;  %v15_v1 = vld [vmem:[%s160_s2] sm:$0xff]  ;;  %v16_v2 = vld [vmem:[%s160_s2 + $0x8] sm:$0xff]  ;;  %110 = vmatprep.mubr.msk.f32.mxu0 %vm122_vm0, %v123_v3  ;;  %vm23_vm1 = vcmask 130048  }
   0x2   :  { %v114_v4 = vpack.c.bf16 %v16_v2, %v15_v1  ;;  %120 = vset.pattern.permute.xlu0 %v124_v5  ;;  %v17_v6 = vld [vmem:[%s161_s1] sm:$0xff] }
   0x3   :  { %20 = vperm.xlu0 %120, %v17_v6   ;;  %v14_v7 = vld [vmem:[%s162_s0] sm:$0xff] }
   0x4   :  { %115 = vmatpush3.bf16.msra.mxu0 %v114_v4 }
   0x7   :  { %111 = vmatmul.mubr.msk.f32.vlgmr.msra.gmra.mrb[0].mxu0 %vm23_vm1, %v14_v7 }
  0x82   :  { %v21_v8 = vpop.permute.xlu0 %20 }
  0xda   :  { %v93_v9 = vpop.f32.mrb[0].mxu0 }
  0xdb   :  { %v94_v10 = vadd.f32 %v93_v9, %v21_v8  ;;  %v112_v11 = vpop.f32.mrb[1].mxu0 }
  0xdd   :  { %97 = vst [vmem:[%s163_s3] sm:$0xff] %v94_v10 }

</bundles_post_ra>
